<compile_context>
chip_gen: v5e
topology: v5e:2x2
jax: 0.10.0
libtpu: 0.0.40
codegen_flags: <defaults>
</compile_context>

<pallas_src>
import functools

import jax
import jax.numpy as jnp
from jax.experimental import pallas as pl
from jax.experimental.pallas import tpu as pltpu

_LANES = 128
_SUBLANES = 8
_MAX_BLOCK_M = 4096                    # (4096,128) f32: 2 inputs x 2 bufs = 8 MiB
_VMEM_LIMIT_BYTES = 32 * 1024 * 1024   # generous headroom; < v7x 64 MiB physical


def _cdiv(a, b):
    return -(-a // b)


def _ls_mse_kernel(x_ref, t_ref, out_ref, *, confidence, smoothing, n_valid,
                   block_m, acc_m, needs_mask):
    i = pl.program_id(0)
    nblk = pl.num_programs(0)

    @pl.when(i == 0)
    def _init():
        out_ref[...] = jnp.zeros_like(out_ref)

    # Inputs keep their (possibly narrow) HBM dtype; upcast in-kernel.  The
    # casts are cheap VPU work hidden under the HBM stream.
    x = x_ref[...]
    if x.dtype != jnp.float32:
        x = x.astype(jnp.float32)
    t = t_ref[...]
    if jnp.issubdtype(t.dtype, jnp.integer) or t.dtype == jnp.bool_:
        t = t.astype(jnp.int32)        # int/bool labels: widen, then to f32
    if t.dtype != jnp.float32:
        t = t.astype(jnp.float32)

    # Label smoothing fused in-kernel (hot path).
    t_s = t * confidence + 0.5 * smoothing
    d = x - t_s
    sq = d * d

    def _accumulate(vals):
        # Fold the (block_m, 128) tile onto the (acc_m, 128) resident output
        # accumulator.  The reshape only splits the sublane axis along native
        # (8,128) tiles (free relayout); the axis-0 sum is acc_m//8 groups of
        # independent VALU add chains (4 chains at acc_m=32).
        out_ref[...] += vals.reshape(block_m // acc_m, acc_m, _LANES).sum(axis=0)

    if needs_mask:
        # Only the last grid block can contain elements past the true count
        # (lane padding of the final row and/or rows past the array extent,
        # whose VMEM contents are undefined).  Mask by global element index;
        # cold path, taken on exactly one grid step.
        is_body = i < nblk - 1

        @pl.when(is_body)
        def _full():
            _accumulate(sq)

        @pl.when(jnp.logical_not(is_body))
        def _tail():
            row = jax.lax.broadcasted_iota(jnp.int32, (block_m, _LANES), 0)
            lane = jax.lax.broadcasted_iota(jnp.int32, (block_m, _LANES), 1)
            gidx = (i * block_m + row) * _LANES + lane
            _accumulate(jnp.where(gidx < n_valid, sq, 0.0))
    else:
        _accumulate(sq)


def label_smoothing_cross_entropy(x, target, smoothing=0.25):
    assert smoothing < 1.0
    confidence = 1.0 - smoothing

    x_f = jnp.asarray(x).reshape(-1)
    t_f = jnp.asarray(target).reshape(-1)
    assert x_f.shape == t_f.shape
    n = int(x_f.shape[0])
    assert n > 0

    rows = _cdiv(n, _LANES)
    lane_pad = rows * _LANES - n
    if lane_pad:
        # Only the rare n % 128 != 0 case pays this copy; padded values are
        # irrelevant (masked in-kernel by global index).
        x_f = jnp.pad(x_f, (0, lane_pad))
        t_f = jnp.pad(t_f, (0, lane_pad))

    x2 = x_f.reshape(rows, _LANES)     # free reshape (contiguous) when no pad
    t2 = t_f.reshape(rows, _LANES)

    # Row-block size: as large as possible (amortize per-step overhead) while
    # never exceeding the array's own row count (trailing partial blocks are
    # handled by the standard Pallas partial-block DMA + in-kernel mask).
    if rows >= _SUBLANES:
        block_m = min(_MAX_BLOCK_M, (rows // _SUBLANES) * _SUBLANES)
    else:
        block_m = rows                 # tiny input: full-extent block
    num_blocks = _cdiv(rows, block_m)

    # Accumulator sublane depth: 32 (4 vregs -> 4 independent add chains) when
    # the block allows it, else the largest tile-aligned depth.
    if block_m % 32 == 0:
        acc_m = 32
    elif block_m % 16 == 0:
        acc_m = 16
    elif block_m % _SUBLANES == 0:
        acc_m = _SUBLANES
    else:
        acc_m = block_m

    # True iff the grid covers any element index >= n (lane padding and/or
    # undefined rows of a partial trailing block).
    needs_mask = num_blocks * block_m * _LANES > n

    kernel = functools.partial(
        _ls_mse_kernel,
        confidence=float(confidence),
        smoothing=float(smoothing),
        n_valid=n,
        block_m=block_m,
        acc_m=acc_m,
        needs_mask=needs_mask,
    )

    data_spec = pl.BlockSpec((block_m, _LANES), lambda i: (i, 0))

    partials = pl.pallas_call(
        kernel,
        out_shape=jax.ShapeDtypeStruct((acc_m, _LANES), jnp.float32),
        grid_spec=pltpu.PrefetchScalarGridSpec(
            num_scalar_prefetch=0,
            grid=(num_blocks,),
            in_specs=[data_spec, data_spec],
            # Constant block index -> output stays resident in VMEM across the
            # whole reduction and is written back to HBM exactly once.
            out_specs=pl.BlockSpec((acc_m, _LANES), lambda i: (0, 0)),
        ),
        compiler_params=pltpu.CompilerParams(
            dimension_semantics=("arbitrary",),
            vmem_limit_bytes=_VMEM_LIMIT_BYTES),
    )(x2, t2)

    # Final tiny reduce + mean over the true (unpadded) element count.
    return jnp.sum(partials) * (1.0 / n)


def _reference(x, target, smoothing=0.25):
    confidence = 1.0 - smoothing
    t = target.astype(jnp.float32) * confidence + 0.5 * smoothing
    return jnp.mean((x.astype(jnp.float32) - t) ** 2)


if __name__ == "__main__":
    key = jax.random.PRNGKey(0)

    # 1) Discriminator-style inputs (matches the PyTorch caller): NCHW labels.
    kx, kt, key = jax.random.split(key, 3)
    x = jax.random.normal(kx, (2, 4, 16, 16), dtype=jnp.float32)
    target = (jax.random.uniform(kt, (2, 4, 16, 16)) > 0.5).astype(jnp.float32)
    loss = jax.block_until_ready(label_smoothing_cross_entropy(x, target, 0.25))
    ref = _reference(x, target, 0.25)
    assert jnp.allclose(loss, ref, rtol=1e-5, atol=1e-6), (loss, ref)

    # 2) Ragged size -> lane pad + in-kernel masked trailing block (2 blocks).
    kx, kt, key = jax.random.split(key, 3)
    x2 = jax.random.normal(kx, (2, 3, 15, 17), dtype=jnp.float32)
    t2 = jax.random.uniform(kt, (2, 3, 15, 17), dtype=jnp.float32)
    loss2 = jax.block_until_ready(label_smoothing_cross_entropy(x2, t2, 0.25))
    ref2 = _reference(x2, t2, 0.25)
    assert jnp.allclose(loss2, ref2, rtol=1e-5, atol=1e-6), (loss2, ref2)

    # 3) Larger size -> two full 4096-row blocks at the max block size.
    kx, kt, key = jax.random.split(key, 3)
    x3 = jax.random.normal(kx, (4, 16, 128, 128), dtype=jnp.float32)
    t3 = (jax.random.uniform(kt, (4, 16, 128, 128)) > 0.5).astype(jnp.float32)
    loss3 = jax.block_until_ready(label_smoothing_cross_entropy(x3, t3, 0.25))
    ref3 = _reference(x3, t3, 0.25)
    assert jnp.allclose(loss3, ref3, rtol=1e-4, atol=1e-6), (loss3, ref3)

    # 4) Narrow HBM dtypes (bf16 logits, int8 labels) upcast in-kernel.
    kx, kt, key = jax.random.split(key, 3)
    x4 = jax.random.normal(kx, (2, 4, 32, 32), dtype=jnp.bfloat16)
    t4 = (jax.random.uniform(kt, (2, 4, 32, 32)) > 0.5).astype(jnp.int8)
    loss4 = jax.block_until_ready(label_smoothing_cross_entropy(x4, t4, 0.25))
    ref4 = _reference(x4, t4, 0.25)
    assert jnp.allclose(loss4, ref4, rtol=1e-4, atol=1e-6), (loss4, ref4)

    print("KERNEL_OK")
</pallas_src>

<mosaic_0001>
module attributes {stable_mosaic.version = 11 : i64} {
  func.func @_ls_mse_kernel(%arg0: i32, %arg1: memref<16x128xf32, #tpu.memory_space<vmem>>, %arg2: memref<16x128xf32, #tpu.memory_space<vmem>>, %arg3: memref<16x128xf32, #tpu.memory_space<vmem>>) attributes {dimension_semantics = [#tpu.dimension_semantics<arbitrary>], iteration_bounds = array<i64: 1>, scalar_prefetch = 0 : i64, scratch_operands = 0 : i64, tpu.core_type = #tpu.core_type<tc>, window_params = [{transform_indices = @transform_0, window_bounds = array<i64: 16, 128>}, {transform_indices = @transform_1, window_bounds = array<i64: 16, 128>}, {pipeline_mode = #tpu.pipeline_mode<synchronous>, transform_indices = @transform_2, window_bounds = array<i64: 16, 128>}]} {
    %c0_i32 = arith.constant 0 : i32
    %0 = arith.cmpi eq, %arg0, %c0_i32 : i32
    %1 = arith.extui %0 : i1 to i32
    %c0_i32_0 = arith.constant 0 : i32
    %2 = arith.cmpi ne, %1, %c0_i32_0 : i32
    scf.if %2 {
      %cst_10 = arith.constant 0.000000e+00 : f32
      %16 = vector.broadcast %cst_10 : f32 to vector<16x128xf32>
      %c0_11 = arith.constant 0 : index
      %c0_12 = arith.constant 0 : index
      %17 = vector.load %arg3[%c0_11, %c0_12] : memref<16x128xf32, #tpu.memory_space<vmem>>, vector<16x128xf32>
      tpu.vector_store %arg3[%c0_11, %c0_12], %16 {strides = array<i32>} : memref<16x128xf32, #tpu.memory_space<vmem>>, vector<16x128xf32>,
    } else {
    }
    %c0 = arith.constant 0 : index
    %c0_1 = arith.constant 0 : index
    %3 = vector.load %arg1[%c0, %c0_1] : memref<16x128xf32, #tpu.memory_space<vmem>>, vector<16x128xf32>
    %c0_2 = arith.constant 0 : index
    %c0_3 = arith.constant 0 : index
    %4 = vector.load %arg2[%c0_2, %c0_3] : memref<16x128xf32, #tpu.memory_space<vmem>>, vector<16x128xf32>
    %cst = arith.constant 7.500000e-01 : f32
    %5 = vector.broadcast %cst : f32 to vector<16x128xf32>
    %6 = arith.mulf %4, %5 : vector<16x128xf32>
    %cst_4 = arith.constant 1.250000e-01 : f32
    %7 = vector.broadcast %cst_4 : f32 to vector<16x128xf32>
    %8 = arith.addf %6, %7 : vector<16x128xf32>
    %9 = arith.subf %3, %8 : vector<16x128xf32>
    %10 = arith.mulf %9, %9 : vector<16x128xf32>
    %c0_5 = arith.constant 0 : index
    %c0_6 = arith.constant 0 : index
    %11 = vector.load %arg3[%c0_5, %c0_6] : memref<16x128xf32, #tpu.memory_space<vmem>>, vector<16x128xf32>
    %12 = vector.shape_cast %10 : vector<16x128xf32> to vector<1x16x128xf32>
    %cst_7 = arith.constant dense<0.000000e+00> : vector<16x128xf32>
    %13 = vector.multi_reduction <add>, %12, %cst_7 [0] : vector<1x16x128xf32> to vector<16x128xf32>
    %14 = arith.addf %11, %13 : vector<16x128xf32>
    %c0_8 = arith.constant 0 : index
    %c0_9 = arith.constant 0 : index
    %15 = vector.load %arg3[%c0_8, %c0_9] : memref<16x128xf32, #tpu.memory_space<vmem>>, vector<16x128xf32>
    tpu.vector_store %arg3[%c0_8, %c0_9], %14 {strides = array<i32>} : memref<16x128xf32, #tpu.memory_space<vmem>>, vector<16x128xf32>,
    return
  }
  func.func @transform_0(%arg0: i32) -> (i32, i32) {
    %c0_i32 = arith.constant 0 : i32
    %c0_i32_0 = arith.constant 0 : i32
    return %arg0, %c0_i32 : i32, i32
  }
  func.func @transform_1(%arg0: i32) -> (i32, i32) {
    %c0_i32 = arith.constant 0 : i32
    %c0_i32_0 = arith.constant 0 : i32
    return %arg0, %c0_i32 : i32, i32
  }
  func.func @transform_2(%arg0: i32) -> (i32, i32) {
    %c0_i32 = arith.constant 0 : i32
    %c0_i32_0 = arith.constant 0 : i32
    %c0_i32_1 = arith.constant 0 : i32
    return %c0_i32, %c0_i32_0 : i32, i32
  }
}

</mosaic_0001>

<bundles_post_ra>
// kernel: tpu_custom_call.1
= control target key start
LH: loop header
LB: loop body
LE: loop exit
PB: predicated region body
PF: predicated region fallthrough
CT: control target
= control target key end

     0   :  { %7 = vsyncpa [#allocation3], 0  ;;  %s212_s0 = inlined_call_operand.hbm [shape: f32[16,128], index: 0, kind: input, shape index: {}]   ;;  %s213_s1 = inlined_call_operand.hbm [shape: f32[16,128], index: 1, kind: input, shape index: {}]   ;;  %s214_s2 = inlined_call_operand.hbm [shape: f32[16,128], index: 2, kind: output, shape index: {}]  }
   0x1   :  { %8 = vsyncpa [#allocation6], 0 }
   0x2   :  { %9 = vsyncpa [#allocation4], 0  ;;  %s14_s11 = sshll.u32 %s212_s0, 4  ;;  %s174_s12 = smov [#allocation2]   ;;  %s15_s11 = int_to_ptr.hbm [resolvable:$true] %s14_s11 }
   0x3   :  { %s16_s13 = sshll.u32 %s174_s12, 4  ;;  %s27_s16 = sshll.u32 %s213_s1, 4  ;;  %s17_s13 = int_to_ptr.vmem [resolvable:$true] %s16_s13  ;;  %s28_s16 = int_to_ptr.hbm [resolvable:$true] %s27_s16 }
   0x4   :  { %s175_s17 = smov 128   ;;  %s176_s18 = smov 8  }
   0x5   :  { %22 = dma.hbm_to_vmem [thread:$0]  %s15_s11, 256, %s17_s13, [#allocation3], %s175_s17, %s175_s17, %s176_s18  }
   0x6   :  { %s177_s19 = smov [#allocation5]  }
   0x7   :  { %s29_s20 = sshll.u32 %s177_s19, 4  ;;  %s30_s20 = int_to_ptr.vmem [resolvable:$true] %s29_s20 }
   0x8   :  { %35 = dma.hbm_to_vmem [thread:$0]  %s28_s16, 256, %s30_s20, [#allocation6], %s175_s17, %s175_s17, %s176_s18  }
   0x9   :  { %168 = dma.done.wait [#allocation3], 256  }
   0xa   :  { %169 = vsyncadd [#allocation3], 4294967040 }
   0xb   :  { %170 = dma.done.wait [#allocation6], 256  }
   0xc   :  { %171 = vsyncadd [#allocation6], 4294967040  ;;  %v52_v0 = vld [vmem:[#allocation5] sm:$0xff]  ;;  %v53_v2 = vld [vmem:[#allocation5 + $0x8] sm:$0xff]  ;;  %s178_s0 = smov [#allocation7]   ;;  %s76_s23 = sshll.u32 %s214_s2, 4  ;;  %s77_s23 = int_to_ptr.hbm [resolvable:$true] %s76_s23 }
   0xd   :  { %v54_v1 = vmul.f32 0.75, %v52_v0  ;;  %v50_v3 = vld [vmem:[#allocation2] sm:$0xff]  ;;  %v55_v4 = vmul.f32 0.75, %v53_v2  ;;  %v51_v6 = vld [vmem:[#allocation2 + $0x8] sm:$0xff]  ;;  %s74_s1 = sshll.u32 %s178_s0, 4  ;;  %s75_s1 = int_to_ptr.vmem [resolvable:$true] %s74_s1 }
   0xf   :  { %v56_v5 = vadd.f32 0.125, %v54_v1  ;;  %v57_v7 = vadd.f32 0.125, %v55_v4 }
  0x11   :  { %v58_v8 = vsub.f32 %v50_v3, %v56_v5  ;;  %v59_v9 = vsub.f32 %v51_v6, %v57_v7 }
  0x13   :  { %v60_v10 = vmul.f32 %v58_v8, %v58_v8  ;;  %v61_v11 = vmul.f32 %v59_v9, %v59_v9 }
  0x15   :  { %68 = vst [vmem:[#allocation7] sm:$0xff] %v60_v10 }
  0x16   :  { %69 = vst [vmem:[#allocation7 + $0x8] sm:$0xff] %v61_v11 }
  0x17   :  { %82 = dma.vmem_to_hbm [thread:$0]  %s75_s1, 256, %s77_s23, [#allocation4], %s175_s17, %s175_s17, %s176_s18  }
  0x18   :  { %172 = dma.done.wait [#allocation4], 256  }
  0x19   :  { %173 = vsyncadd [#allocation4], 4294967040 }
  0x1a   :  { %87 = vsyncpa [#allocation3], 1 }
  0x1b   :  { %88 = vsyncpa [#allocation6], 1 }
  0x1c   :  { %89 = vsyncpa [#allocation4], 1 }

</bundles_post_ra>
